<compile_context>
chip_gen: v7x
topology: tpu7x:2x2x1
jax: 0.10.0
libtpu: 0.0.40
codegen_flags: <defaults>
</compile_context>

<pallas_src>
import jax
import jax.numpy as jnp
from jax.experimental import pallas as pl
from jax.experimental.pallas import tpu as pltpu

LANE = 128
MAX_TILE = 512
VMEM_RESIDENT_BUDGET = 40 * 1024 * 1024   # conservative: leaves headroom on v7x (64 MiB VMEM)
VMEM_LIMIT_BYTES = 48 * 1024 * 1024       # valid on all generations (v7x physical = 64 MiB)


def _round_up(n, m):
    return (n + m - 1) // m * m


def _pick_tile(n_pad, cap, min_tiles=1):
    """Largest multiple of 128 that divides n_pad, is <= cap, and leaves >= min_tiles tiles."""
    best = 128
    t = 128
    top = min(cap, n_pad)
    while t <= top:
        if n_pad % t == 0 and n_pad // t >= min_tiles:
            best = t
        t += 128
    return best


def _xw_scale_kernel(x_ref, w_ref, d_ref, o_ref):
    # XW_scaled = d_inv_sqrt[:, None] * (X @ W)   (right-hand D^-1/2), emitted in bf16.
    xw = jnp.dot(x_ref[...], w_ref[...], preferred_element_type=jnp.float32)
    o_ref[...] = (d_ref[...] * xw).astype(o_ref.dtype)


def _agg_resident_kernel(a_ref, xw_ref, d_ref, b_ref, o_ref):
    # XW stays resident in VMEM for the whole grid; one bf16 x bf16 MXU matmul per row tile.
    acc = jnp.dot(a_ref[...].astype(jnp.bfloat16), xw_ref[...],
                  preferred_element_type=jnp.float32)
    o_ref[...] = jnp.maximum(d_ref[...] * acc + b_ref[...], 0.0).astype(o_ref.dtype)


def _agg_tiled_kernel(a_ref, xw_ref, d_ref, b_ref, o_ref):
    # k-tiled fallback: accumulate directly into the resident f32 output block.
    k = pl.program_id(1)

    @pl.when(k == 0)
    def _():
        o_ref[...] = jnp.zeros_like(o_ref)

    o_ref[...] += jnp.dot(a_ref[...].astype(jnp.bfloat16), xw_ref[...],
                          preferred_element_type=jnp.float32)

    @pl.when(k == pl.num_programs(1) - 1)
    def _():
        # left D^-1/2 row scaling + bias + Identity norm + ReLU, lane-dense store.
        o_ref[...] = jnp.maximum(d_ref[...] * o_ref[...] + b_ref[...], 0.0)


def message_passing_layer(x, edge_index, w, b, *, xw_resident=None):
    """Forward of MessagePassingLayer (GCNConv + Identity norm + ReLU).

    x: [N, F_in] f32, edge_index: [2, E] i32, w: [F_in, F_out] f32, b: [F_out] f32.
    """
    N, F_in = x.shape
    F_out = w.shape[1]

    N_pad = _round_up(N, LANE)
    F_in_pad = _round_up(F_in, LANE)
    F_pad = _round_up(F_out, LANE)

    # ---- glue: binary adjacency + self loops, built directly into the padded int8 buffer
    #      (no f32 NxN intermediates); symmetric-norm degree vector from a single row-sum ----
    # TODO(synk): for large *sparse* graphs, replace this dense O(N^2) adjacency with a
    # scalar-prefetched CSR row-pointer/col-index table + manual DMA gather of XW rows.
    src, dst = edge_index[0], edge_index[1]
    a_hat = jnp.zeros((N_pad, N_pad), dtype=jnp.int8)
    a_hat = a_hat.at[dst, src].set(jnp.int8(1))            # dedups duplicate edges
    diag = jnp.arange(N)
    a_hat = a_hat.at[diag, diag].add(jnp.int8(1))          # + I (self loops); values in {0,1,2}
    deg = jnp.sum(a_hat, axis=1, dtype=jnp.float32)        # padded rows -> deg 0
    d_inv_sqrt = jnp.where(deg > 0.0, jax.lax.rsqrt(jnp.maximum(deg, 1.0)), 0.0)
    d_col = d_inv_sqrt.reshape(N_pad, 1)

    x_pad = jnp.zeros((N_pad, F_in_pad), jnp.float32).at[:N, :F_in].set(x)
    w_pad = jnp.zeros((F_in_pad, F_pad), jnp.float32).at[:F_in, :F_out].set(w)
    b_pad = jnp.zeros((1, F_pad), jnp.float32).at[0, :F_out].set(b)

    # ---- kernel 1: XW_scaled = d[:,None] * (X @ W), bf16 output (halves kernel-2 traffic) ----
    tm1 = _pick_tile(N_pad, MAX_TILE, min_tiles=2 if N_pad >= 2 * LANE else 1)
    xw_scaled = pl.pallas_call(
        _xw_scale_kernel,
        out_shape=jax.ShapeDtypeStruct((N_pad, F_pad), jnp.bfloat16),
        grid=(N_pad // tm1,),
        in_specs=[
            pl.BlockSpec((tm1, F_in_pad), lambda i: (i, 0)),
            pl.BlockSpec((F_in_pad, F_pad), lambda i: (0, 0)),
            pl.BlockSpec((tm1, 1), lambda i: (i, 0)),
        ],
        out_specs=pl.BlockSpec((tm1, F_pad), lambda i: (i, 0)),
        compiler_params=pltpu.CompilerParams(dimension_semantics=("parallel",)),
    )(x_pad, w_pad, d_col)

    # ---- kernel 2: out = relu(d * (A_hat @ XW_scaled) + b) ----
    # >= 2 row tiles when possible so the "parallel" axis uses both v7x TensorCores.
    tm = _pick_tile(N_pad, MAX_TILE, min_tiles=2 if N_pad >= 2 * LANE else 1)

    if xw_resident is None:
        # VMEM estimate for the resident plan: resident bf16 XW + double-buffered int8 A row
        # blocks (+ in-kernel bf16 upcast) + double-buffered f32 output blocks.
        est = (N_pad * F_pad * 2
               + 2 * tm * N_pad
               + tm * N_pad * 2
               + 2 * tm * F_pad * 4)
        xw_resident = est <= VMEM_RESIDENT_BUDGET

    if xw_resident:
        out = pl.pallas_call(
            _agg_resident_kernel,
            out_shape=jax.ShapeDtypeStruct((N_pad, F_pad), jnp.float32),
            grid=(N_pad // tm,),
            in_specs=[
                pl.BlockSpec((tm, N_pad), lambda i: (i, 0)),      # A row block (int8)
                pl.BlockSpec((N_pad, F_pad), lambda i: (0, 0)),   # XW resident (bf16), DMA'd once
                pl.BlockSpec((tm, 1), lambda i: (i, 0)),          # d_inv_sqrt rows
                pl.BlockSpec((1, F_pad), lambda i: (0, 0)),       # bias
            ],
            out_specs=pl.BlockSpec((tm, F_pad), lambda i: (i, 0)),
            compiler_params=pltpu.CompilerParams(
                dimension_semantics=("parallel",),
                vmem_limit_bytes=VMEM_LIMIT_BYTES),
        )(a_hat, xw_scaled, d_col, b_pad)
    else:
        tk = _pick_tile(N_pad, MAX_TILE, min_tiles=1)
        out = pl.pallas_call(
            _agg_tiled_kernel,
            out_shape=jax.ShapeDtypeStruct((N_pad, F_pad), jnp.float32),
            grid=(N_pad // tm, N_pad // tk),
            in_specs=[
                pl.BlockSpec((tm, tk), lambda i, k: (i, k)),      # A tile (int8)
                pl.BlockSpec((tk, F_pad), lambda i, k: (k, 0)),   # XW tile (bf16)
                pl.BlockSpec((tm, 1), lambda i, k: (i, 0)),       # d_inv_sqrt rows
                pl.BlockSpec((1, F_pad), lambda i, k: (0, 0)),    # bias
            ],
            out_specs=pl.BlockSpec((tm, F_pad), lambda i, k: (i, 0)),
            compiler_params=pltpu.CompilerParams(
                dimension_semantics=("parallel", "arbitrary"),
                vmem_limit_bytes=VMEM_LIMIT_BYTES),
        )(a_hat, xw_scaled, d_col, b_pad)

    return out[:N, :F_out]


def reference(x, edge_index, w, b):
    N = x.shape[0]
    src, dst = edge_index[0], edge_index[1]
    adj = jnp.zeros((N, N), dtype=jnp.float32).at[dst, src].add(1.0)
    adj = jnp.clip(adj, 0.0, 1.0) + jnp.eye(N, dtype=jnp.float32)
    deg = adj.sum(axis=1)
    d = jnp.where(deg > 0, 1.0 / jnp.sqrt(deg), 0.0)
    a_norm = d[:, None] * adj * d[None, :]
    return jnp.maximum(a_norm @ (x @ w) + b[None, :], 0.0)


def _make_problem(key, N, E, F_in, F_out):
    k_x, k_e, k_w, k_b = jax.random.split(key, 4)
    x = jax.random.normal(k_x, (N, F_in), dtype=jnp.float32)
    edge_index = jax.random.randint(k_e, (2, E), 0, N, dtype=jnp.int32)
    limit = (6.0 / (F_in + F_out)) ** 0.5
    w = jax.random.uniform(k_w, (F_in, F_out), minval=-limit, maxval=limit,
                           dtype=jnp.float32)
    b = 0.1 * jax.random.normal(k_b, (F_out,), dtype=jnp.float32)
    return x, edge_index, w, b


if __name__ == "__main__":
    fwd = jax.jit(message_passing_layer, static_argnames=("xw_resident",))
    TOL = dict(atol=2e-2, rtol=2e-2)   # XW is carried in bf16 (rounding, not a bug)

    # --- test 1: module-sized toy problem (single row tile, XW-resident path) ---
    x, ei, w, b = _make_problem(jax.random.PRNGKey(0), N=16, E=40, F_in=32, F_out=32)
    out = jax.block_until_ready(fwd(x, ei, w, b))
    ref = reference(x, ei, w, b)
    assert out.shape == (16, 32)
    assert jnp.allclose(out, ref, **TOL), "mismatch (small graph, resident path)"

    # --- test 2: N > tile size exercises the multi-row-tile XW-resident path ---
    x, ei, w, b = _make_problem(jax.random.PRNGKey(1), N=300, E=1500, F_in=48, F_out=64)
    out = jax.block_until_ready(fwd(x, ei, w, b))
    ref = reference(x, ei, w, b)
    assert out.shape == (300, 64)
    assert jnp.allclose(out, ref, **TOL), "mismatch (tiled rows, resident path)"

    # --- test 3: force the k-tiled fallback (multi-tile reduction + pl.when init/finalize) ---
    x, ei, w, b = _make_problem(jax.random.PRNGKey(2), N=700, E=4000, F_in=48, F_out=64)
    out = jax.block_until_ready(fwd(x, ei, w, b, xw_resident=False))
    ref = reference(x, ei, w, b)
    assert out.shape == (700, 64)
    assert jnp.allclose(out, ref, **TOL), "mismatch (k-tiled fallback path)"

    print("KERNEL_OK")
</pallas_src>

<mosaic_0001>
module attributes {stable_mosaic.version = 11 : i64} {
  func.func @_xw_scale_kernel(%arg0: i32, %arg1: memref<128x128xf32, #tpu.memory_space<vmem>>, %arg2: memref<128x128xf32, #tpu.memory_space<vmem>>, %arg3: memref<128x1xf32, #tpu.memory_space<vmem>>, %arg4: memref<128x128xbf16, #tpu.memory_space<vmem>>) attributes {dimension_semantics = [#tpu.dimension_semantics<parallel>], iteration_bounds = array<i64: 1>, scalar_prefetch = 0 : i64, scratch_operands = 0 : i64, tpu.core_type = #tpu.core_type<tc>, window_params = [{transform_indices = @transform_0, window_bounds = array<i64: 128, 128>}, {pipeline_mode = #tpu.pipeline_mode<synchronous>, transform_indices = @transform_1, window_bounds = array<i64: 128, 128>}, {transform_indices = @transform_2, window_bounds = array<i64: 128, 1>}, {transform_indices = @transform_3, window_bounds = array<i64: 128, 128>}]} {
    %c0 = arith.constant 0 : index
    %c0_0 = arith.constant 0 : index
    %0 = vector.load %arg1[%c0, %c0_0] : memref<128x128xf32, #tpu.memory_space<vmem>>, vector<128x128xf32>
    %c0_1 = arith.constant 0 : index
    %c0_2 = arith.constant 0 : index
    %1 = vector.load %arg2[%c0_1, %c0_2] : memref<128x128xf32, #tpu.memory_space<vmem>>, vector<128x128xf32>
    %cst = arith.constant dense<0.000000e+00> : vector<128x128xf32>
    %2 = tpu.matmul %0, %1, %cst {dimension_numbers = #tpu.dot_dimension_numbers<[1], [0], [0], [1], [0, 0, 1, 1], [], []>} : vector<128x128xf32>, vector<128x128xf32>, vector<128x128xf32> -> vector<128x128xf32>
    %c0_3 = arith.constant 0 : index
    %c0_4 = arith.constant 0 : index
    %3 = vector.load %arg3[%c0_3, %c0_4] : memref<128x1xf32, #tpu.memory_space<vmem>>, vector<128x1xf32>
    %4 = vector.broadcast %3 : vector<128x1xf32> to vector<128x128xf32>
    %5 = arith.mulf %4, %2 : vector<128x128xf32>
    %6 = arith.truncf %5 : vector<128x128xf32> to vector<128x128xbf16>
    %c0_5 = arith.constant 0 : index
    %c0_6 = arith.constant 0 : index
    %7 = vector.load %arg4[%c0_5, %c0_6] : memref<128x128xbf16, #tpu.memory_space<vmem>>, vector<128x128xbf16>
    tpu.vector_store %arg4[%c0_5, %c0_6], %6 {strides = array<i32>} : memref<128x128xbf16, #tpu.memory_space<vmem>>, vector<128x128xbf16>,
    return
  }
  func.func @transform_0(%arg0: i32) -> (i32, i32) {
    %c0_i32 = arith.constant 0 : i32
    %c0_i32_0 = arith.constant 0 : i32
    return %arg0, %c0_i32 : i32, i32
  }
  func.func @transform_1(%arg0: i32) -> (i32, i32) {
    %c0_i32 = arith.constant 0 : i32
    %c0_i32_0 = arith.constant 0 : i32
    %c0_i32_1 = arith.constant 0 : i32
    return %c0_i32, %c0_i32_0 : i32, i32
  }
  func.func @transform_2(%arg0: i32) -> (i32, i32) {
    %c0_i32 = arith.constant 0 : i32
    %c0_i32_0 = arith.constant 0 : i32
    return %arg0, %c0_i32 : i32, i32
  }
  func.func @transform_3(%arg0: i32) -> (i32, i32) {
    %c0_i32 = arith.constant 0 : i32
    %c0_i32_0 = arith.constant 0 : i32
    return %arg0, %c0_i32 : i32, i32
  }
}

module attributes {stable_mosaic.version = 11 : i64} {
  func.func @_agg_resident_kernel(%arg0: i32, %arg1: memref<128x128xi8, #tpu.memory_space<vmem>>, %arg2: memref<128x128xbf16, #tpu.memory_space<vmem>>, %arg3: memref<128x1xf32, #tpu.memory_space<vmem>>, %arg4: memref<1x128xf32, #tpu.memory_space<vmem>>, %arg5: memref<128x128xf32, #tpu.memory_space<vmem>>) attributes {dimension_semantics = [#tpu.dimension_semantics<parallel>], iteration_bounds = array<i64: 1>, scalar_prefetch = 0 : i64, scratch_operands = 0 : i64, tpu.core_type = #tpu.core_type<tc>, window_params = [{transform_indices = @transform_0, window_bounds = array<i64: 128, 128>}, {pipeline_mode = #tpu.pipeline_mode<synchronous>, transform_indices = @transform_1, window_bounds = array<i64: 128, 128>}, {transform_indices = @transform_2, window_bounds = array<i64: 128, 1>}, {pipeline_mode = #tpu.pipeline_mode<synchronous>, transform_indices = @transform_3, window_bounds = array<i64: 1, 128>}, {transform_indices = @transform_4, window_bounds = array<i64: 128, 128>}]} {
    %c0 = arith.constant 0 : index
    %c0_0 = arith.constant 0 : index
    %0 = vector.load %arg1[%c0, %c0_0] : memref<128x128xi8, #tpu.memory_space<vmem>>, vector<128x128xi8>
    %1 = arith.sitofp %0 : vector<128x128xi8> to vector<128x128xbf16>
    %c0_1 = arith.constant 0 : index
    %c0_2 = arith.constant 0 : index
    %2 = vector.load %arg2[%c0_1, %c0_2] : memref<128x128xbf16, #tpu.memory_space<vmem>>, vector<128x128xbf16>
    %cst = arith.constant dense<0.000000e+00> : vector<128x128xf32>
    %3 = tpu.matmul %1, %2, %cst {dimension_numbers = #tpu.dot_dimension_numbers<[1], [0], [0], [1], [0, 0, 1, 1], [], []>} : vector<128x128xbf16>, vector<128x128xbf16>, vector<128x128xf32> -> vector<128x128xf32>
    %c0_3 = arith.constant 0 : index
    %c0_4 = arith.constant 0 : index
    %4 = vector.load %arg3[%c0_3, %c0_4] : memref<128x1xf32, #tpu.memory_space<vmem>>, vector<128x1xf32>
    %5 = vector.broadcast %4 : vector<128x1xf32> to vector<128x128xf32>
    %6 = arith.mulf %5, %3 : vector<128x128xf32>
    %c0_5 = arith.constant 0 : index
    %c0_6 = arith.constant 0 : index
    %7 = vector.load %arg4[%c0_5, %c0_6] : memref<1x128xf32, #tpu.memory_space<vmem>>, vector<1x128xf32>
    %8 = vector.broadcast %7 : vector<1x128xf32> to vector<128x128xf32>
    %9 = arith.addf %6, %8 : vector<128x128xf32>
    %cst_7 = arith.constant 0.000000e+00 : f32
    %10 = vector.broadcast %cst_7 : f32 to vector<128x128xf32>
    %11 = arith.maximumf %9, %10 : vector<128x128xf32>
    %c0_8 = arith.constant 0 : index
    %c0_9 = arith.constant 0 : index
    %12 = vector.load %arg5[%c0_8, %c0_9] : memref<128x128xf32, #tpu.memory_space<vmem>>, vector<128x128xf32>
    tpu.vector_store %arg5[%c0_8, %c0_9], %11 {strides = array<i32>} : memref<128x128xf32, #tpu.memory_space<vmem>>, vector<128x128xf32>,
    return
  }
  func.func @transform_0(%arg0: i32) -> (i32, i32) {
    %c0_i32 = arith.constant 0 : i32
    %c0_i32_0 = arith.constant 0 : i32
    return %arg0, %c0_i32 : i32, i32
  }
  func.func @transform_1(%arg0: i32) -> (i32, i32) {
    %c0_i32 = arith.constant 0 : i32
    %c0_i32_0 = arith.constant 0 : i32
    %c0_i32_1 = arith.constant 0 : i32
    return %c0_i32, %c0_i32_0 : i32, i32
  }
  func.func @transform_2(%arg0: i32) -> (i32, i32) {
    %c0_i32 = arith.constant 0 : i32
    %c0_i32_0 = arith.constant 0 : i32
    return %arg0, %c0_i32 : i32, i32
  }
  func.func @transform_3(%arg0: i32) -> (i32, i32) {
    %c0_i32 = arith.constant 0 : i32
    %c0_i32_0 = arith.constant 0 : i32
    %c0_i32_1 = arith.constant 0 : i32
    return %c0_i32, %c0_i32_0 : i32, i32
  }
  func.func @transform_4(%arg0: i32) -> (i32, i32) {
    %c0_i32 = arith.constant 0 : i32
    %c0_i32_0 = arith.constant 0 : i32
    return %arg0, %c0_i32 : i32, i32
  }
}

</mosaic_0001>

<bundles_post_ra>
// kernel: message_passing_layer.2
= control target key start
LH: loop header
LB: loop body
LE: loop exit
PB: predicated region body
PF: predicated region fallthrough
CT: control target
= control target key end

     0   :  { %v605_v3 = vmov 0   ;;  %s794_s1 = inlined_call_operand.vmem [shape: f32[128,128], index: 1, kind: input, shape index: {}]   ;;  %s795_s0 = inlined_call_operand.vmem [shape: f32[128,128], index: 0, kind: input, shape index: {}]   ;;  %s796_s2 = inlined_call_operand.vmem [shape: f32[128,1], index: 2, kind: input, shape index: {}]   ;;  %s797_s3 = inlined_call_operand.vmem [shape: bf16[128,128], index: 3, kind: output, shape index: {}]  }
   0x1   :  { %v30_v0 = vld [vmem:[%s794_s1] sm:$0xff]  ;;  %v31_v1 = vld [vmem:[%s794_s1 + $0x8] sm:$0xff]  ;;  %v32_v2 = vld [vmem:[%s794_s1 + $0x10] sm:$0xff]  ;;  %604 = vset.pattern.permute.xlu1 %v605_v3  ;;  %603 = vset.pattern.permute.xlu0 %v605_v3 }
   0x2   :  { %v554_v4 = vpack.c.bf16 %v31_v1, %v30_v0  ;;  %v33_v5 = vld [vmem:[%s794_s1 + $0x18] sm:$0xff]  ;;  %v34_v7 = vld [vmem:[%s794_s1 + $0x20] sm:$0xff]  ;;  %v35_v8 = vld [vmem:[%s794_s1 + $0x28] sm:$0xff] }
   0x3   :  { %v558_v6 = vpack.c.bf16 %v33_v5, %v32_v2  ;;  %v562_v9 = vpack.c.bf16 %v35_v8, %v34_v7  ;;  %v14_v10 = vld [vmem:[%s795_s0] sm:$0xff]  ;;  %v36_v12 = vld [vmem:[%s794_s1 + $0x30] sm:$0xff]  ;;  %v37_v13 = vld [vmem:[%s794_s1 + $0x38] sm:$0xff] }
   0x4   :  { %555 = vmatprep.subr.bf16.mxu0 %v554_v4  ;;  %586 = vmatprep.subr.bf16.mxu1 %v554_v4  ;;  %v22_v11 = vld [vmem:[%s795_s0 + $0x40] sm:$0xff]  ;;  %v566_v14 = vpack.c.bf16 %v37_v13, %v36_v12  ;;  %v39_v16 = vld [vmem:[%s794_s1 + $0x48] sm:$0xff]  ;;  %v193_v17 = vld [vmem:[%s796_s2 + $0x10] sm:$0xff] }
   0x5   :  { %557 = vmatpush3.bf16.msra.mxu0 %v554_v4  ;;  %594 = vmatpush3.bf16.msra.mxu1 %v554_v4  ;;  %v38_v15 = vld [vmem:[%s794_s1 + $0x40] sm:$0xff]  ;;  %v194_v19 = vld [vmem:[%s796_s2 + $0x18] sm:$0xff]  ;;  %v40_v21 = vld [vmem:[%s794_s1 + $0x50] sm:$0xff] }
   0x6   :  { %559 = vmatprep.subr.bf16.mxu0 %v558_v6  ;;  %587 = vmatprep.subr.bf16.mxu1 %v558_v6  ;;  %v191_v18 = vld [vmem:[%s796_s2] sm:$0xff]  ;;  %v570_v20 = vpack.c.bf16 %v39_v16, %v38_v15  ;;  %v41_v22 = vld [vmem:[%s794_s1 + $0x58] sm:$0xff]  ;;  %v192_v23 = vld [vmem:[%s796_s2 + $0x8] sm:$0xff] }
   0x7   :  { %530 = vmatprep.mubr.f32.mxu0 %v14_v10  ;;  %542 = vmatprep.mubr.f32.mxu1 %v22_v11  ;;  %v196_v24 = vld [vmem:[%s796_s2 + $0x28] sm:$0xff]  ;;  %v574_v25 = vpack.c.bf16 %v41_v22, %v40_v21  ;;  %v42_v26 = vld [vmem:[%s794_s1 + $0x60] sm:$0xff]  ;;  %v198_v29 = vld [vmem:[%s796_s2 + $0x38] sm:$0xff] }
   0x8   :  { %219 = vperm.xlu1 %604, %v193_v17   ;;  %209 = vperm.xlu0 %603, %v191_v18   ;;  %v43_v27 = vld [vmem:[%s794_s1 + $0x68] sm:$0xff]  ;;  %v195_v28 = vld [vmem:[%s796_s2 + $0x20] sm:$0xff]  ;;  %v44_v31 = vld [vmem:[%s794_s1 + $0x70] sm:$0xff] }
   0x9   :  { %561 = vmatpush3.bf16.msra.mxu0 %v558_v6  ;;  %595 = vmatpush3.bf16.msra.mxu1 %v558_v6  ;;  %v578_v30 = vpack.c.bf16 %v43_v27, %v42_v26  ;;  %v45_v32 = vld [vmem:[%s794_s1 + $0x78] sm:$0xff]  ;;  %v197_v33 = vld [vmem:[%s796_s2 + $0x30] sm:$0xff]  ;;  %v200_v34 = vld [vmem:[%s796_s2 + $0x48] sm:$0xff] }
   0xa   :  { %563 = vmatprep.subr.bf16.mxu0 %v562_v9  ;;  %588 = vmatprep.subr.bf16.mxu1 %v562_v9  ;;  %v582_v35 = vpack.c.bf16 %v45_v32, %v44_v31  ;;  %v199_v36 = vld [vmem:[%s796_s2 + $0x40] sm:$0xff]  ;;  %v202_v37 = vld [vmem:[%s796_s2 + $0x58] sm:$0xff]  ;;  %v201_v38 = vld [vmem:[%s796_s2 + $0x50] sm:$0xff] }
   0xb   :  { %v15_v39 = vld [vmem:[%s795_s0 + $0x8] sm:$0xff]  ;;  %v16_v41 = vld [vmem:[%s795_s0 + $0x10] sm:$0xff]  ;;  %v203_v44 = vld [vmem:[%s796_s2 + $0x60] sm:$0xff] }
   0xc   :  { %224 = vperm.xlu1 %604, %v194_v19   ;;  %214 = vperm.xlu0 %603, %v192_v23   ;;  %v23_v40 = vld [vmem:[%s795_s0 + $0x48] sm:$0xff]  ;;  %v24_v42 = vld [vmem:[%s795_s0 + $0x50] sm:$0xff]  ;;  %v17_v45 = vld [vmem:[%s795_s0 + $0x18] sm:$0xff] }
   0xd   :  { %565 = vmatpush3.bf16.msra.mxu0 %v562_v9  ;;  %596 = vmatpush3.bf16.msra.mxu1 %v562_v9  ;;  %v204_v43 = vld [vmem:[%s796_s2 + $0x68] sm:$0xff]  ;;  %v25_v46 = vld [vmem:[%s795_s0 + $0x58] sm:$0xff]  ;;  %v18_v47 = vld [vmem:[%s795_s0 + $0x20] sm:$0xff] }
   0xe   :  { %567 = vmatprep.subr.bf16.mxu0 %v566_v14  ;;  %589 = vmatprep.subr.bf16.mxu1 %v566_v14  ;;  %v26_v48 = vld [vmem:[%s795_s0 + $0x60] sm:$0xff]  ;;  %v206_v49 = vld [vmem:[%s796_s2 + $0x78] sm:$0xff]  ;;  %v205_v50 = vld [vmem:[%s796_s2 + $0x70] sm:$0xff] }
   0xf   :  { %v19_v51 = vld [vmem:[%s795_s0 + $0x28] sm:$0xff]  ;;  %v20_v53 = vld [vmem:[%s795_s0 + $0x30] sm:$0xff]  ;;  %v21_v55 = vld [vmem:[%s795_s0 + $0x38] sm:$0xff] }
  0x10   :  { %234 = vperm.xlu1 %604, %v196_v24   ;;  %229 = vperm.xlu0 %603, %v195_v28   ;;  %v27_v52 = vld [vmem:[%s795_s0 + $0x68] sm:$0xff]  ;;  %v28_v54 = vld [vmem:[%s795_s0 + $0x70] sm:$0xff]  ;;  %v29_v56 = vld [vmem:[%s795_s0 + $0x78] sm:$0xff] }
  0x11   :  { %569 = vmatpush3.bf16.msra.mxu0 %v566_v14  ;;  %597 = vmatpush3.bf16.msra.mxu1 %v566_v14 }
  0x12   :  { %571 = vmatprep.subr.bf16.mxu0 %v570_v20  ;;  %590 = vmatprep.subr.bf16.mxu1 %v570_v20 }
  0x14   :  { %244 = vperm.xlu1 %604, %v198_v29   ;;  %239 = vperm.xlu0 %603, %v197_v33  }
  0x15   :  { %573 = vmatpush3.bf16.msra.mxu0 %v570_v20  ;;  %598 = vmatpush3.bf16.msra.mxu1 %v570_v20 }
  0x16   :  { %575 = vmatprep.subr.bf16.mxu0 %v574_v25  ;;  %591 = vmatprep.subr.bf16.mxu1 %v574_v25 }
  0x18   :  { %254 = vperm.xlu1 %604, %v200_v34   ;;  %249 = vperm.xlu0 %603, %v199_v36  }
  0x19   :  { %577 = vmatpush3.bf16.msra.mxu0 %v574_v25  ;;  %599 = vmatpush3.bf16.msra.mxu1 %v574_v25 }
  0x1a   :  { %579 = vmatprep.subr.bf16.mxu0 %v578_v30  ;;  %592 = vmatprep.subr.bf16.mxu1 %v578_v30 }
  0x1c   :  { %264 = vperm.xlu1 %604, %v202_v37   ;;  %259 = vperm.xlu0 %603, %v201_v38  }
  0x1d   :  { %581 = vmatpush3.bf16.msra.mxu0 %v578_v30  ;;  %600 = vmatpush3.bf16.msra.mxu1 %v578_v30 }
  0x1e   :  { %583 = vmatprep.subr.bf16.mxu0 %v582_v35  ;;  %593 = vmatprep.subr.bf16.mxu1 %v582_v35 }
  0x20   :  { %274 = vperm.xlu1 %604, %v204_v43   ;;  %269 = vperm.xlu0 %603, %v203_v44  }
  0x21   :  { %585 = vmatpush3.bf16.msra.mxu0 %v582_v35  ;;  %601 = vmatpush3.bf16.msra.mxu1 %v582_v35 }
  0x24   :  { %531 = vmatmul.mubr.f32.vlgmr.msra.gmra.mrb[0].mxu0 %v15_v39  ;;  %543 = vmatmul.mubr.f32.vlgmr.msra.gmra.mrb[0].mxu1 %v23_v40 }
  0x25   :  { %533 = vmatprep.mubr.f32.mxu0 %v16_v41  ;;  %545 = vmatprep.mubr.f32.mxu1 %v24_v42 }
  0x26   :  { %284 = vperm.xlu1 %604, %v206_v49   ;;  %279 = vperm.xlu0 %603, %v205_v50  }
  0x28   :  { %534 = vmatmul.mubr.f32.gmra.mrb[2].mxu0 %v17_v45  ;;  %546 = vmatmul.mubr.f32.gmra.mrb[2].mxu1 %v25_v46 }
  0x29   :  { %536 = vmatprep.mubr.f32.mxu0 %v18_v47  ;;  %548 = vmatprep.mubr.f32.mxu1 %v26_v48 }
  0x2c   :  { %537 = vmatmul.mubr.f32.gmra.mrb[4].mxu0 %v19_v51  ;;  %549 = vmatmul.mubr.f32.gmra.mrb[4].mxu1 %v27_v52 }
  0x2d   :  { %539 = vmatprep.mubr.f32.mxu0 %v20_v53  ;;  %551 = vmatprep.mubr.f32.mxu1 %v28_v54 }
  0x30   :  { %540 = vmatmul.mubr.f32.gmra.mrb[6].mxu0 %v21_v55  ;;  %552 = vmatmul.mubr.f32.gmra.mrb[6].mxu1 %v29_v56 }
  0x87   :  { %v220_v57 = vpop.permute.xlu1 %219  ;;  %v210_v58 = vpop.permute.xlu0 %209 }
  0x8b   :  { %v225_v59 = vpop.permute.xlu1 %224  ;;  %v215_v60 = vpop.permute.xlu0 %214 }
  0x8f   :  { %v235_v61 = vpop.permute.xlu1 %234  ;;  %v230_v62 = vpop.permute.xlu0 %229 }
  0x93   :  { %v245_v63 = vpop.permute.xlu1 %244  ;;  %v240_v0 = vpop.permute.xlu0 %239 }
  0x97   :  { %v255_v1 = vpop.permute.xlu1 %254  ;;  %v250_v2 = vpop.permute.xlu0 %249 }
  0x9b   :  { %v265_v3 = vpop.permute.xlu1 %264  ;;  %v260_v4 = vpop.permute.xlu0 %259 }
  0x9f   :  { %v275_v13 = vpop.permute.xlu1 %274  ;;  %v270_v14 = vpop.permute.xlu0 %269 }
  0xa5   :  { %v285_v35 = vpop.permute.xlu1 %284  ;;  %v280_v36 = vpop.permute.xlu0 %279 }
  0xf7   :  { %v532_v5 = vpop.f32.mrb[0].mxu0  ;;  %v544_v6 = vpop.f32.mrb[0].mxu1 }
  0xf8   :  { %v288_v7 = vmul.f32 %v532_v5, %v215_v60  ;;  %v296_v8 = vmul.f32 %v544_v6, %v255_v1  ;;  %v112_v9 = vpop.f32.mrb[1].mxu0  ;;  %v152_v10 = vpop.f32.mrb[1].mxu1 }
  0xf9   :  { %v287_v11 = vmul.f32 %v210_v58, %v112_v9  ;;  %v295_v12 = vmul.f32 %v250_v2, %v152_v10 }
  0xfb   :  { %v422_v15 = vpack.c.bf16 %v288_v7, %v287_v11  ;;  %v442_v16 = vpack.c.bf16 %v296_v8, %v295_v12  ;;  %v535_v17 = vpop.f32.mrb[2].mxu0  ;;  %v547_v18 = vpop.f32.mrb[2].mxu1 }
  0xfc   :  { %v290_v19 = vmul.f32 %v535_v17, %v225_v59  ;;  %v298_v20 = vmul.f32 %v547_v18, %v265_v3  ;;  %v122_v21 = vpop.f32.mrb[3].mxu0  ;;  %v162_v22 = vpop.f32.mrb[3].mxu1 }
  0xfd   :  { %423 = vst [vmem:[%s797_s3] sm:$0xff] %v422_v15   ;;  %462 = vst [vmem:[%s797_s3 + $0x20] sm:$0xff] %v442_v16   ;;  %v289_v23 = vmul.f32 %v220_v57, %v122_v21  ;;  %v297_v24 = vmul.f32 %v260_v4, %v162_v22 }
  0xff   :  { %v427_v25 = vpack.c.bf16 %v290_v19, %v289_v23  ;;  %v447_v26 = vpack.c.bf16 %v298_v20, %v297_v24  ;;  %v538_v27 = vpop.f32.mrb[4].mxu0  ;;  %v550_v28 = vpop.f32.mrb[4].mxu1 }
 0x100   :  { %v292_v29 = vmul.f32 %v538_v27, %v235_v61  ;;  %v300_v30 = vmul.f32 %v550_v28, %v275_v13  ;;  %v132_v31 = vpop.f32.mrb[5].mxu0  ;;  %v172_v32 = vpop.f32.mrb[5].mxu1 }
 0x101   :  { %459 = vst [vmem:[%s797_s3 + $0x8] sm:$0xff] %v427_v25   ;;  %463 = vst [vmem:[%s797_s3 + $0x28] sm:$0xff] %v447_v26   ;;  %v291_v33 = vmul.f32 %v230_v62, %v132_v31  ;;  %v299_v34 = vmul.f32 %v270_v14, %v172_v32 }
 0x103   :  { %v432_v37 = vpack.c.bf16 %v292_v29, %v291_v33  ;;  %v452_v38 = vpack.c.bf16 %v300_v30, %v299_v34  ;;  %v541_v39 = vpop.f32.mrb[6].mxu0  ;;  %v553_v40 = vpop.f32.mrb[6].mxu1 }
 0x104   :  { %v294_v41 = vmul.f32 %v541_v39, %v245_v63  ;;  %v302_v42 = vmul.f32 %v553_v40, %v285_v35  ;;  %v142_v43 = vpop.f32.mrb[7].mxu0  ;;  %v182_v44 = vpop.f32.mrb[7].mxu1 }
 0x105   :  { %460 = vst [vmem:[%s797_s3 + $0x10] sm:$0xff] %v432_v37   ;;  %464 = vst [vmem:[%s797_s3 + $0x30] sm:$0xff] %v452_v38   ;;  %v293_v45 = vmul.f32 %v240_v0, %v142_v43  ;;  %v301_v46 = vmul.f32 %v280_v36, %v182_v44 }
 0x107   :  { %v437_v47 = vpack.c.bf16 %v294_v41, %v293_v45  ;;  %v457_v48 = vpack.c.bf16 %v302_v42, %v301_v46 }
 0x109   :  { %461 = vst [vmem:[%s797_s3 + $0x18] sm:$0xff] %v437_v47   ;;  %465 = vst [vmem:[%s797_s3 + $0x38] sm:$0xff] %v457_v48  }

// kernel: message_passing_layer.3
= control target key start
LH: loop header
LB: loop body
LE: loop exit
PB: predicated region body
PF: predicated region fallthrough
CT: control target
= control target key end

     0   :  { %v522_v1 = vmov 0   ;;  %s746_s1 = inlined_call_operand.vmem [shape: bf16[128,128], index: 1, kind: input, shape index: {}]   ;;  %s747_s0 = inlined_call_operand.vmem [shape: s8[128,128], index: 0, kind: input, shape index: {}]   ;;  %s748_s2 = inlined_call_operand.vmem [shape: f32[128,1], index: 2, kind: input, shape index: {}]   ;;  %s749_s3 = inlined_call_operand.vmem [shape: f32[1,128], index: 3, kind: input, shape index: {}]   ;;  %s750_s4 = inlined_call_operand.vmem [shape: f32[128,128], index: 4, kind: output, shape index: {}]  }
   0x1   :  { %v514_v0 = vld [vmem:[%s746_s1] sm:$0xff]   ;;  %513 = vset.pattern.permute.xlu1 %v522_v1  ;;  %512 = vset.pattern.permute.xlu0 %v522_v1  ;;  %v515_v2 = vld [vmem:[%s746_s1 + $0x8] sm:$0xff]   ;;  %v516_v3 = vld [vmem:[%s746_s1 + $0x10] sm:$0xff]  }
   0x2   :  { %463 = vmatprep.subr.bf16.mxu0 %v514_v0  ;;  %495 = vmatprep.subr.bf16.mxu1 %v514_v0  ;;  %v517_v4 = vld [vmem:[%s746_s1 + $0x18] sm:$0xff]   ;;  %v18_v5 = vld [vmem:[%s747_s0] sm:$0x3]  ;;  %v19_v6 = vld [vmem:[%s747_s0 + $0x2] sm:$0x3] }
   0x3   :  { %464 = vmatpush3.bf16.msra.mxu0 %v514_v0  ;;  %503 = vmatpush3.bf16.msra.mxu1 %v514_v0  ;;  %v26_v7 = vld [vmem:[%s747_s0 + $0x10] sm:$0x3]  ;;  %v34_v8 = vunpack.c.l.s8.bf16 %v18_v5  ;;  %v35_v9 = vunpack.c.l.s8.bf16 %v19_v6  ;;  %v27_v10 = vld [vmem:[%s747_s0 + $0x12] sm:$0x3]  ;;  %v518_v14 = vld [vmem:[%s746_s1 + $0x20] sm:$0xff]  }
   0x4   :  { %465 = vmatprep.subr.bf16.mxu0 %v515_v2  ;;  %496 = vmatprep.subr.bf16.mxu1 %v515_v2  ;;  %v42_v11 = vunpack.c.l.s8.bf16 %v26_v7  ;;  %v43_v12 = vunpack.c.l.s8.bf16 %v27_v10  ;;  %v261_v16 = vld [vmem:[%s748_s2 + $0x10] sm:$0xff]  ;;  %v259_v17 = vld [vmem:[%s748_s2] sm:$0xff]  ;;  %v262_v18 = vld [vmem:[%s748_s2 + $0x18] sm:$0xff] }
   0x5   :  { %v430_v13 = vcombine.low %v34_v8, %v35_v9  ;;  %287 = vperm.xlu1 %513, %v261_v16   ;;  %v519_v19 = vld [vmem:[%s746_s1 + $0x28] sm:$0xff]   ;;  %277 = vperm.xlu0 %512, %v259_v17   ;;  %v520_v22 = vld [vmem:[%s746_s1 + $0x30] sm:$0xff]   ;;  %v20_v23 = vld [vmem:[%s747_s0 + $0x4] sm:$0x3] }
   0x6   :  { %v434_v15 = vcombine.low %v42_v11, %v43_v12  ;;  %v260_v20 = vld [vmem:[%s748_s2 + $0x8] sm:$0xff]  ;;  %v521_v24 = vld [vmem:[%s746_s1 + $0x38] sm:$0xff]   ;;  %v21_v25 = vld [vmem:[%s747_s0 + $0x6] sm:$0x3]  ;;  %v36_v34 = vunpack.c.l.s8.bf16 %v20_v23 }
   0x7   :  { %466 = vmatpush3.bf16.msra.mxu0 %v515_v2  ;;  %504 = vmatpush3.bf16.msra.mxu1 %v515_v2  ;;  %v264_v21 = vld [vmem:[%s748_s2 + $0x28] sm:$0xff]  ;;  %v28_v26 = vld [vmem:[%s747_s0 + $0x14] sm:$0x3]  ;;  %v263_v27 = vld [vmem:[%s748_s2 + $0x20] sm:$0xff]  ;;  %v37_v35 = vunpack.c.l.s8.bf16 %v21_v25 }
   0x8   :  { %467 = vmatprep.subr.bf16.mxu0 %v516_v3  ;;  %497 = vmatprep.subr.bf16.mxu1 %v516_v3  ;;  %v29_v28 = vld [vmem:[%s747_s0 + $0x16] sm:$0x3]  ;;  %v22_v29 = vld [vmem:[%s747_s0 + $0x8] sm:$0x3]  ;;  %v266_v30 = vld [vmem:[%s748_s2 + $0x38] sm:$0xff]  ;;  %v44_v36 = vunpack.c.l.s8.bf16 %v28_v26 }
   0x9   :  { %479 = vmatprep.mubr.bf16.mxu0 %v430_v13  ;;  %487 = vmatprep.mubr.bf16.mxu1 %v434_v15  ;;  %v23_v31 = vld [vmem:[%s747_s0 + $0xa] sm:$0x3]  ;;  %v30_v32 = vld [vmem:[%s747_s0 + $0x18] sm:$0x3]  ;;  %v31_v33 = vld [vmem:[%s747_s0 + $0x1a] sm:$0x3]  ;;  %v45_v37 = vunpack.c.l.s8.bf16 %v29_v28  ;;  %v38_v39 = vunpack.c.l.s8.bf16 %v22_v29  ;;  %v431_v44 = vcombine.low %v36_v34, %v37_v35 }
   0xa   :  { %292 = vperm.xlu1 %513, %v262_v18   ;;  %282 = vperm.xlu0 %512, %v260_v20   ;;  %v265_v38 = vld [vmem:[%s748_s2 + $0x30] sm:$0xff]  ;;  %v39_v40 = vunpack.c.l.s8.bf16 %v23_v31  ;;  %v46_v41 = vunpack.c.l.s8.bf16 %v30_v32  ;;  %v47_v42 = vunpack.c.l.s8.bf16 %v31_v33  ;;  %v268_v43 = vld [vmem:[%s748_s2 + $0x48] sm:$0xff]  ;;  %v267_v47 = vld [vmem:[%s748_s2 + $0x40] sm:$0xff] }
   0xb   :  { %468 = vmatpush3.bf16.msra.mxu0 %v516_v3  ;;  %505 = vmatpush3.bf16.msra.mxu1 %v516_v3  ;;  %v435_v45 = vcombine.low %v44_v36, %v45_v37  ;;  %v24_v46 = vld [vmem:[%s747_s0 + $0xc] sm:$0x3]  ;;  %v25_v50 = vld [vmem:[%s747_s0 + $0xe] sm:$0x3]  ;;  %v32_v51 = vld [vmem:[%s747_s0 + $0x1c] sm:$0x3] }
   0xc   :  { %469 = vmatprep.subr.bf16.mxu0 %v517_v4  ;;  %498 = vmatprep.subr.bf16.mxu1 %v517_v4  ;;  %v432_v48 = vcombine.low %v38_v39, %v39_v40  ;;  %v436_v49 = vcombine.low %v46_v41, %v47_v42  ;;  %v33_v52 = vld [vmem:[%s747_s0 + $0x1e] sm:$0x3]  ;;  %v40_v54 = vunpack.c.l.s8.bf16 %v24_v46  ;;  %v41_v55 = vunpack.c.l.s8.bf16 %v25_v50  ;;  %v269_v58 = vld [vmem:[%s748_s2 + $0x50] sm:$0xff]  ;;  %v272_v59 = vld [vmem:[%s748_s2 + $0x68] sm:$0xff] }
   0xd   :  { %v270_v53 = vld [vmem:[%s748_s2 + $0x58] sm:$0xff]  ;;  %v48_v56 = vunpack.c.l.s8.bf16 %v32_v51  ;;  %v49_v57 = vunpack.c.l.s8.bf16 %v33_v52  ;;  %v271_v62 = vld [vmem:[%s748_s2 + $0x60] sm:$0xff]  ;;  %v273_v0 = vld [vmem:[%s748_s2 + $0x70] sm:$0xff] }
   0xe   :  { %302 = vperm.xlu1 %513, %v264_v21   ;;  %297 = vperm.xlu0 %512, %v263_v27   ;;  %v433_v60 = vcombine.low %v40_v54, %v41_v55  ;;  %v274_v63 = vld [vmem:[%s748_s2 + $0x78] sm:$0xff]  ;;  %v677_v16 = vld [vmem:[%s749_s3] ss:$0 sm:$0xff] }
   0xf   :  { %470 = vmatpush3.bf16.msra.mxu0 %v517_v4  ;;  %506 = vmatpush3.bf16.msra.mxu1 %v517_v4  ;;  %v437_v61 = vcombine.low %v48_v56, %v49_v57 }
  0x10   :  { %471 = vmatprep.subr.bf16.mxu0 %v518_v14  ;;  %499 = vmatprep.subr.bf16.mxu1 %v518_v14 }
  0x12   :  { %312 = vperm.xlu1 %513, %v266_v30   ;;  %307 = vperm.xlu0 %512, %v265_v38  }
  0x13   :  { %472 = vmatpush3.bf16.msra.mxu0 %v518_v14  ;;  %507 = vmatpush3.bf16.msra.mxu1 %v518_v14 }
  0x14   :  { %473 = vmatprep.subr.bf16.mxu0 %v519_v19  ;;  %500 = vmatprep.subr.bf16.mxu1 %v519_v19 }
  0x16   :  { %322 = vperm.xlu1 %513, %v268_v43   ;;  %317 = vperm.xlu0 %512, %v267_v47  }
  0x17   :  { %474 = vmatpush3.bf16.msra.mxu0 %v519_v19  ;;  %508 = vmatpush3.bf16.msra.mxu1 %v519_v19 }
  0x18   :  { %475 = vmatprep.subr.bf16.mxu0 %v520_v22  ;;  %501 = vmatprep.subr.bf16.mxu1 %v520_v22 }
  0x1a   :  { %332 = vperm.xlu1 %513, %v270_v53   ;;  %327 = vperm.xlu0 %512, %v269_v58  }
  0x1b   :  { %476 = vmatpush3.bf16.msra.mxu0 %v520_v22  ;;  %509 = vmatpush3.bf16.msra.mxu1 %v520_v22 }
  0x1c   :  { %477 = vmatprep.subr.bf16.mxu0 %v521_v24  ;;  %502 = vmatprep.subr.bf16.mxu1 %v521_v24 }
  0x1e   :  { %342 = vperm.xlu1 %513, %v272_v59   ;;  %337 = vperm.xlu0 %512, %v271_v62  }
  0x1f   :  { %478 = vmatpush3.bf16.msra.mxu0 %v521_v24  ;;  %510 = vmatpush3.bf16.msra.mxu1 %v521_v24 }
  0x22   :  { %480 = vmatmul.mubr.bf16.vlgmr.msra.gmra.mrb[0].mxu0 %v431_v44  ;;  %488 = vmatmul.mubr.bf16.vlgmr.msra.gmra.mrb[0].mxu1 %v435_v45 }
  0x23   :  { %483 = vmatprep.mubr.bf16.mxu0 %v432_v48  ;;  %491 = vmatprep.mubr.bf16.mxu1 %v436_v49 }
  0x24   :  { %352 = vperm.xlu1 %513, %v274_v63   ;;  %347 = vperm.xlu0 %512, %v273_v0  }
  0x2a   :  { %484 = vmatmul.mubr.bf16.gmra.mrb[4].mxu0 %v433_v60  ;;  %492 = vmatmul.mubr.bf16.gmra.mrb[4].mxu1 %v437_v61 }
  0x84   :  { %v288_v1 = vpop.permute.xlu1 %287  ;;  %v278_v2 = vpop.permute.xlu0 %277 }
  0x89   :  { %v293_v3 = vpop.permute.xlu1 %292  ;;  %v283_v4 = vpop.permute.xlu0 %282 }
  0x8d   :  { %v668_v5 = vpop.permute.xlu1 %302  ;;  %v298_v6 = vpop.permute.xlu0 %297 }
  0x91   :  { %v670_v7 = vpop.permute.xlu1 %312  ;;  %v308_v8 = vpop.permute.xlu0 %307 }
  0x95   :  { %v323_v9 = vpop.permute.xlu1 %322  ;;  %v318_v10 = vpop.permute.xlu0 %317 }
  0x99   :  { %v333_v11 = vpop.permute.xlu1 %332  ;;  %v328_v12 = vpop.permute.xlu0 %327 }
  0x9d   :  { %v672_v13 = vpop.permute.xlu1 %342  ;;  %v338_v14 = vpop.permute.xlu0 %337 }
  0xa3   :  { %v353_v44 = vpop.permute.xlu1 %352  ;;  %v348_v45 = vpop.permute.xlu0 %347 }
  0xf5   :  { %v481_v15 = vpop.f32.mrb[0].mxu0  ;;  %v489_v17 = vpop.f32.mrb[0].mxu1 }
  0xf6   :  { %v357_v18 = vmul.f32 %v481_v15, %v288_v1  ;;  %v365_v19 = vmul.f32 %v489_v17, %v328_v12  ;;  %v196_v20 = vpop.f32.mrb[1].mxu0  ;;  %v228_v21 = vpop.f32.mrb[1].mxu1 }
  0xf7   :  { %v355_v22 = vmul.f32 %v278_v2, %v196_v20  ;;  %v363_v23 = vmul.f32 %v318_v10, %v228_v21  ;;  %v482_v24 = vpop.f32.mrb[2].mxu0  ;;  %v490_v25 = vpop.f32.mrb[2].mxu1 }
  0xf8   :  { %v380_v26 = vadd.f32 %v677_v16, %v357_v18  ;;  %v388_v27 = vadd.f32 %v677_v16, %v365_v19  ;;  %v358_v28 = vmul.f32 %v482_v24, %v293_v3  ;;  %v366_v29 = vmul.f32 %v490_v25, %v333_v11  ;;  %v199_v30 = vpop.f32.mrb[3].mxu0  ;;  %v231_v31 = vpop.f32.mrb[3].mxu1 }
  0xf9   :  { %v378_v32 = vadd.f32 %v677_v16, %v355_v22  ;;  %v386_v33 = vadd.f32 %v677_v16, %v363_v23  ;;  %v356_v34 = vmul.f32 %v283_v4, %v199_v30  ;;  %v364_v35 = vmul.f32 %v323_v9, %v231_v31 }
  0xfa   :  { %v396_v36 = vmax.f32 %v380_v26, 0.0  ;;  %v404_v37 = vmax.f32 %v388_v27, 0.0  ;;  %v381_v38 = vadd.f32 %v677_v16, %v358_v28  ;;  %v389_v39 = vadd.f32 %v677_v16, %v366_v29 }
  0xfb   :  { %v394_v40 = vmax.f32 %v378_v32, 0.0  ;;  %v402_v41 = vmax.f32 %v386_v33, 0.0  ;;  %v379_v42 = vadd.f32 %v677_v16, %v356_v34  ;;  %v387_v43 = vadd.f32 %v677_v16, %v364_v35 }
  0xfc   :  { %412 = vst [vmem:[%s750_s4 + $0x10] sm:$0xff] %v396_v36  ;;  %420 = vst [vmem:[%s750_s4 + $0x50] sm:$0xff] %v404_v37  ;;  %v397_v46 = vmax.f32 %v381_v38, 0.0  ;;  %v405_v47 = vmax.f32 %v389_v39, 0.0 }
  0xfd   :  { %410 = vst [vmem:[%s750_s4] sm:$0xff] %v394_v40  ;;  %418 = vst [vmem:[%s750_s4 + $0x40] sm:$0xff] %v402_v41  ;;  %v395_v48 = vmax.f32 %v379_v42, 0.0  ;;  %v403_v49 = vmax.f32 %v387_v43, 0.0  ;;  %v485_v50 = vpop.f32.mrb[4].mxu0  ;;  %v493_v51 = vpop.f32.mrb[4].mxu1 }
  0xfe   :  { %413 = vst [vmem:[%s750_s4 + $0x18] sm:$0xff] %v397_v46  ;;  %421 = vst [vmem:[%s750_s4 + $0x58] sm:$0xff] %v405_v47  ;;  %v361_v52 = vmul.f32 %v485_v50, %v308_v8  ;;  %v369_v53 = vmul.f32 %v493_v51, %v348_v45  ;;  %v212_v54 = vpop.f32.mrb[5].mxu0  ;;  %v244_v55 = vpop.f32.mrb[5].mxu1 }
  0xff   :  { %411 = vst [vmem:[%s750_s4 + $0x8] sm:$0xff] %v395_v48  ;;  %419 = vst [vmem:[%s750_s4 + $0x48] sm:$0xff] %v403_v49  ;;  %v359_v56 = vmul.f32 %v298_v6, %v212_v54  ;;  %v367_v57 = vmul.f32 %v338_v14, %v244_v55  ;;  %v486_v58 = vpop.f32.mrb[6].mxu0  ;;  %v494_v59 = vpop.f32.mrb[6].mxu1 }
 0x100   :  { %v384_v60 = vadd.f32 %v677_v16, %v361_v52  ;;  %v392_v61 = vadd.f32 %v677_v16, %v369_v53  ;;  %v362_v62 = vmul.f32 %v486_v58, %v670_v7  ;;  %v370_v63 = vmul.f32 %v494_v59, %v353_v44  ;;  %v215_v0 = vpop.f32.mrb[7].mxu0  ;;  %v247_v1 = vpop.f32.mrb[7].mxu1 }
 0x101   :  { %v382_v2 = vadd.f32 %v677_v16, %v359_v56  ;;  %v390_v3 = vadd.f32 %v677_v16, %v367_v57  ;;  %v360_v4 = vmul.f32 %v668_v5, %v215_v0  ;;  %v368_v6 = vmul.f32 %v672_v13, %v247_v1 }
 0x102   :  { %v400_v8 = vmax.f32 %v384_v60, 0.0  ;;  %v408_v9 = vmax.f32 %v392_v61, 0.0  ;;  %v385_v10 = vadd.f32 %v677_v16, %v362_v62  ;;  %v393_v11 = vadd.f32 %v677_v16, %v370_v63 }
 0x103   :  { %v398_v12 = vmax.f32 %v382_v2, 0.0  ;;  %v406_v14 = vmax.f32 %v390_v3, 0.0  ;;  %v383_v7 = vadd.f32 %v677_v16, %v360_v4  ;;  %v391_v15 = vadd.f32 %v677_v16, %v368_v6 }
 0x104   :  { %416 = vst [vmem:[%s750_s4 + $0x30] sm:$0xff] %v400_v8  ;;  %424 = vst [vmem:[%s750_s4 + $0x70] sm:$0xff] %v408_v9  ;;  %v401_v5 = vmax.f32 %v385_v10, 0.0  ;;  %v409_v13 = vmax.f32 %v393_v11, 0.0 }
 0x105   :  { %414 = vst [vmem:[%s750_s4 + $0x20] sm:$0xff] %v398_v12  ;;  %422 = vst [vmem:[%s750_s4 + $0x60] sm:$0xff] %v406_v14  ;;  %v399_v17 = vmax.f32 %v383_v7, 0.0  ;;  %v407_v16 = vmax.f32 %v391_v15, 0.0 }
 0x106   :  { %417 = vst [vmem:[%s750_s4 + $0x38] sm:$0xff] %v401_v5  ;;  %425 = vst [vmem:[%s750_s4 + $0x78] sm:$0xff] %v409_v13 }
 0x107   :  { %415 = vst [vmem:[%s750_s4 + $0x28] sm:$0xff] %v399_v17  ;;  %423 = vst [vmem:[%s750_s4 + $0x68] sm:$0xff] %v407_v16 }

</bundles_post_ra>
